<compile_context>
chip_gen: v5e
topology: v5e:2x2
jax: 0.10.0
libtpu: 0.0.40
codegen_flags: <defaults>
</compile_context>

<pallas_src>
import jax
import jax.numpy as jnp
from jax.experimental import pallas as pl
from jax.experimental.pallas import tpu as pltpu

EPS = 1e-05


def _round_up(x, m):
    return ((x + m - 1) // m) * m


def _const_spec(block_shape, index_map):
    """BlockSpec for a grid-invariant operand: single-buffer it when supported."""
    try:
        return pl.BlockSpec(block_shape, index_map, pipeline_mode=pl.Buffered(1))
    except (TypeError, ValueError):
        # Older/other JAX builds without pipeline_mode: fall back to default buffering.
        return pl.BlockSpec(block_shape, index_map)


def _make_kernel(patch_dim, dim, mxu_dtype):
    inv_pd = 1.0 / float(patch_dim)
    inv_d = 1.0 / float(dim)

    def kernel(x_ref, w_ref, b_ref, g2_ref, o_ref):
        # x_ref: (tm, pd_p) token tile; padded K columns are exactly zero.
        x = x_ref[...]
        xf = x.astype(jnp.float32)

        # RMSNorm-in statistics over the *actual* patch_dim (sum * 1/patch_dim).
        ms = jnp.sum(xf * xf, axis=-1, keepdims=True) * inv_pd
        r1 = jax.lax.rsqrt(ms + EPS)

        # gamma_in is folded into the weight rows (wrapper); apply the rsqrt scale to
        # the (smaller) matmul output instead of the (tm, K) input tile.
        y = jnp.dot(x.astype(mxu_dtype), w_ref[...],
                    preferred_element_type=jnp.float32)
        y = y * r1 + b_ref[...]

        # RMSNorm-out over the *actual* dim; padded N columns are exactly zero.
        ms2 = jnp.sum(y * y, axis=-1, keepdims=True) * inv_d
        out = y * jax.lax.rsqrt(ms2 + EPS) * g2_ref[...]

        o_ref[...] = out.astype(o_ref.dtype)

    return kernel


def patch_embed_pallas(x, patch_size, g1, w, b, g2, *, tm=512, mxu_bf16=None,
                       out_dtype=None):
    """x: (B, C, H, W). g1: (patch_dim,), w: (patch_dim, dim), b: (dim,), g2: (dim,)."""
    B, C, H, W = x.shape
    p = patch_size
    hgrid, wgrid = H // p, W // p
    patch_dim = C * p * p
    dim = w.shape[1]
    num_patches = hgrid * wgrid
    M = B * num_patches

    if out_dtype is None:
        out_dtype = x.dtype
    if mxu_bf16 is None:
        # Accuracy/speed flag: bf16 MXU operands (f32 accumulation) whenever either
        # side is already bf16; callers may force True for speed / False for accuracy.
        mxu_bf16 = (x.dtype == jnp.bfloat16) or (w.dtype == jnp.bfloat16)
    mxu_dtype = jnp.bfloat16 if mxu_bf16 else jnp.float32

    # Under the bf16-MXU flag, move the patchified slab in bf16 (halves x HBM traffic
    # of both the rearrange and the kernel's input DMA).
    if mxu_bf16 and x.dtype == jnp.float32:
        x = x.astype(jnp.bfloat16)

    # Patchify glue: rearrange 'b c (h p1) (w p2) -> b (h w) (p1 p2 c)'.
    xt = x.reshape(B, C, hgrid, p, wgrid, p)          # b c h p1 w p2
    xt = jnp.transpose(xt, (0, 2, 4, 3, 5, 1))        # b h w p1 p2 c
    xt = xt.reshape(M, patch_dim)                     # (tokens, patch_dim)

    # Lane-dense K and N: pad patch_dim and dim to multiples of 128 with zeros.
    pd_p = _round_up(patch_dim, 128)
    dim_p = _round_up(dim, 128)
    if pd_p != patch_dim:
        xt = jnp.pad(xt, ((0, 0), (0, pd_p - patch_dim)))

    # Token tiling: multiple of 8, >= 2 grid iterations when possible so the
    # "parallel" token axis actually splits across v7x's two TensorCores.
    tm_eff = _round_up(max(8, min(tm, _round_up(pl.cdiv(M, 2), 8))), 8)
    M_pad = _round_up(M, tm_eff)
    if M_pad != M:
        xt = jnp.pad(xt, ((0, M_pad - M), (0, 0)))    # zero rows: rsqrt(eps) finite

    # Hoist all grid-invariant parameter prep out of the kernel: fold gamma_in into
    # the weight rows, cast to the MXU dtype, pad to (pd_p, dim_p).
    wg = (g1.astype(jnp.float32)[:, None] * w.astype(jnp.float32)).astype(mxu_dtype)
    bp = b.astype(jnp.float32)
    g2p = g2.astype(jnp.float32)
    if pd_p != patch_dim or dim_p != dim:
        wg = jnp.pad(wg, ((0, pd_p - patch_dim), (0, dim_p - dim)))
    if dim_p != dim:
        bp = jnp.pad(bp, (0, dim_p - dim))
        g2p = jnp.pad(g2p, (0, dim_p - dim))
    b_2d = bp.reshape(1, dim_p)
    g2_2d = g2p.reshape(1, dim_p)

    # VMEM budget: double-buffered x/out tiles, single-buffered resident weight,
    # generous allowance for f32 intermediates; cap below v7x's 64 MiB per-TC VMEM.
    vmem_bytes = (2 * tm_eff * pd_p * xt.dtype.itemsize
                  + 2 * tm_eff * dim_p * jnp.dtype(out_dtype).itemsize
                  + 2 * pd_p * dim_p * wg.dtype.itemsize
                  + 8 * dim_p * 4
                  + 4 * tm_eff * (pd_p + dim_p) * 4)
    vmem_limit = min(int(vmem_bytes * 1.5) + (2 << 20), 48 << 20)

    kernel = _make_kernel(patch_dim, dim, mxu_dtype)

    out = pl.pallas_call(
        kernel,
        out_shape=jax.ShapeDtypeStruct((M_pad, dim_p), out_dtype),
        grid_spec=pltpu.PrefetchScalarGridSpec(
            num_scalar_prefetch=0,
            grid=(M_pad // tm_eff,),
            in_specs=[
                pl.BlockSpec((tm_eff, pd_p), lambda i: (i, 0)),   # x token tile
                _const_spec((pd_p, dim_p), lambda i: (0, 0)),     # gamma_in-folded W
                _const_spec((1, dim_p), lambda i: (0, 0)),        # bias
                _const_spec((1, dim_p), lambda i: (0, 0)),        # gamma_out
            ],
            out_specs=pl.BlockSpec((tm_eff, dim_p), lambda i: (i, 0)),
        ),
        compiler_params=pltpu.CompilerParams(
            dimension_semantics=("parallel",),   # token axis shards across v7x TCs
            vmem_limit_bytes=vmem_limit,
        ),
    )(xt, wg, b_2d, g2_2d)

    if M_pad != M or dim_p != dim:
        out = out[:M, :dim]
    return out.reshape(B, num_patches, dim)


def patch_embed_ref(x, patch_size, g1, w, b, g2):
    B, C, H, W = x.shape
    p = patch_size
    h, wgrid = H // p, W // p
    xt = x.reshape(B, C, h, p, wgrid, p)
    xt = jnp.transpose(xt, (0, 2, 4, 3, 5, 1)).reshape(B, h * wgrid, C * p * p)
    xt = xt.astype(jnp.float32)
    xn = xt * jax.lax.rsqrt(jnp.mean(xt * xt, -1, keepdims=True) + EPS) * g1
    y = xn @ w.astype(jnp.float32) + b
    yn = y * jax.lax.rsqrt(jnp.mean(y * y, -1, keepdims=True) + EPS) * g2
    return yn.astype(x.dtype)


if __name__ == "__main__":
    # Module hyperparams (small, consistent with the forward):
    B, C, H, W = 2, 4, 16, 16
    patch_size = 4
    patch_dim = C * patch_size ** 2      # 64
    dim = 32

    key = jax.random.PRNGKey(0)
    kx, kw, kb = jax.random.split(key, 3)

    x = jax.random.normal(kx, (B, C, H, W), dtype=jnp.float32)

    # Deterministic parameter init (shapes from __init__):
    g1 = jnp.ones((patch_dim,), jnp.float32)                         # RMSNorm(patch_dim).weight
    w = jax.random.normal(kw, (patch_dim, dim), jnp.float32) * 0.05  # proj weight (transposed)
    b = jax.random.normal(kb, (dim,), jnp.float32) * 0.01            # proj bias
    g2 = jnp.ones((dim,), jnp.float32)                               # RMSNorm(dim).weight

    ref = patch_embed_ref(x, patch_size, g1, w, b, g2)

    # f32 path (tight tolerance).
    out = patch_embed_pallas(x, patch_size, g1, w, b, g2)
    out = jax.block_until_ready(out)
    assert out.shape == (B, (H // patch_size) * (W // patch_size), dim)
    assert jnp.allclose(out, ref, atol=1e-4, rtol=1e-4), "f32 mismatch vs reference"

    # bf16 MXU path (loose tolerance), exercising the fast-matmul configuration.
    out_bf16 = patch_embed_pallas(x.astype(jnp.bfloat16), patch_size, g1,
                                  w.astype(jnp.bfloat16), b, g2)
    out_bf16 = jax.block_until_ready(out_bf16)
    assert out_bf16.shape == out.shape
    assert jnp.allclose(out_bf16.astype(jnp.float32), ref.astype(jnp.float32),
                        atol=5e-2, rtol=5e-2), "bf16 mismatch vs reference"

    print("KERNEL_OK")
</pallas_src>

<mosaic_0001>
module attributes {stable_mosaic.version = 11 : i64} {
  func.func @kernel(%arg0: i32, %arg1: memref<16x128xf32, #tpu.memory_space<vmem>>, %arg2: memref<128x128xf32, #tpu.memory_space<vmem>>, %arg3: memref<1x128xf32, #tpu.memory_space<vmem>>, %arg4: memref<1x128xf32, #tpu.memory_space<vmem>>, %arg5: memref<16x128xf32, #tpu.memory_space<vmem>>) attributes {dimension_semantics = [#tpu.dimension_semantics<parallel>], iteration_bounds = array<i64: 2>, scalar_prefetch = 0 : i64, scratch_operands = 0 : i64, tpu.core_type = #tpu.core_type<tc>, window_params = [{transform_indices = @transform_0, window_bounds = array<i64: 16, 128>}, {pipeline_mode = #tpu.pipeline_mode<synchronous>, transform_indices = @transform_1, window_bounds = array<i64: 128, 128>}, {pipeline_mode = #tpu.pipeline_mode<synchronous>, transform_indices = @transform_2, window_bounds = array<i64: 1, 128>}, {pipeline_mode = #tpu.pipeline_mode<synchronous>, transform_indices = @transform_3, window_bounds = array<i64: 1, 128>}, {transform_indices = @transform_4, window_bounds = array<i64: 16, 128>}]} {
    %c0 = arith.constant 0 : index
    %c0_0 = arith.constant 0 : index
    %0 = vector.load %arg1[%c0, %c0_0] : memref<16x128xf32, #tpu.memory_space<vmem>>, vector<16x128xf32>
    %1 = arith.mulf %0, %0 : vector<16x128xf32>
    %cst = arith.constant dense<0.000000e+00> : vector<16xf32>
    %2 = vector.multi_reduction <add>, %1, %cst [1] : vector<16x128xf32> to vector<16xf32>
    %3 = vector.shape_cast %2 : vector<16xf32> to vector<16x1xf32>
    %cst_1 = arith.constant 1.562500e-02 : f32
    %4 = vector.broadcast %cst_1 : f32 to vector<16x1xf32>
    %5 = arith.mulf %3, %4 : vector<16x1xf32>
    %cst_2 = arith.constant 9.99999974E-6 : f32
    %6 = vector.broadcast %cst_2 : f32 to vector<16x1xf32>
    %7 = arith.addf %5, %6 : vector<16x1xf32>
    %8 = math.rsqrt %7 : vector<16x1xf32>
    %c0_3 = arith.constant 0 : index
    %c0_4 = arith.constant 0 : index
    %9 = vector.load %arg2[%c0_3, %c0_4] : memref<128x128xf32, #tpu.memory_space<vmem>>, vector<128x128xf32>
    %cst_5 = arith.constant dense<0.000000e+00> : vector<16x128xf32>
    %10 = tpu.matmul %0, %9, %cst_5 {dimension_numbers = #tpu.dot_dimension_numbers<[1], [0], [0], [1], [0, 0, 1, 1], [], []>} : vector<16x128xf32>, vector<128x128xf32>, vector<16x128xf32> -> vector<16x128xf32>
    %11 = vector.broadcast %8 : vector<16x1xf32> to vector<16x128xf32>
    %12 = arith.mulf %10, %11 : vector<16x128xf32>
    %c0_6 = arith.constant 0 : index
    %c0_7 = arith.constant 0 : index
    %13 = vector.load %arg3[%c0_6, %c0_7] : memref<1x128xf32, #tpu.memory_space<vmem>>, vector<1x128xf32>
    %14 = vector.broadcast %13 : vector<1x128xf32> to vector<16x128xf32>
    %15 = arith.addf %12, %14 : vector<16x128xf32>
    %16 = arith.mulf %15, %15 : vector<16x128xf32>
    %cst_8 = arith.constant dense<0.000000e+00> : vector<16xf32>
    %17 = vector.multi_reduction <add>, %16, %cst_8 [1] : vector<16x128xf32> to vector<16xf32>
    %18 = vector.shape_cast %17 : vector<16xf32> to vector<16x1xf32>
    %cst_9 = arith.constant 3.125000e-02 : f32
    %19 = vector.broadcast %cst_9 : f32 to vector<16x1xf32>
    %20 = arith.mulf %18, %19 : vector<16x1xf32>
    %cst_10 = arith.constant 9.99999974E-6 : f32
    %21 = vector.broadcast %cst_10 : f32 to vector<16x1xf32>
    %22 = arith.addf %20, %21 : vector<16x1xf32>
    %23 = math.rsqrt %22 : vector<16x1xf32>
    %24 = vector.broadcast %23 : vector<16x1xf32> to vector<16x128xf32>
    %25 = arith.mulf %15, %24 : vector<16x128xf32>
    %c0_11 = arith.constant 0 : index
    %c0_12 = arith.constant 0 : index
    %26 = vector.load %arg4[%c0_11, %c0_12] : memref<1x128xf32, #tpu.memory_space<vmem>>, vector<1x128xf32>
    %27 = vector.broadcast %26 : vector<1x128xf32> to vector<16x128xf32>
    %28 = arith.mulf %25, %27 : vector<16x128xf32>
    %c0_13 = arith.constant 0 : index
    %c0_14 = arith.constant 0 : index
    %29 = vector.load %arg5[%c0_13, %c0_14] : memref<16x128xf32, #tpu.memory_space<vmem>>, vector<16x128xf32>
    tpu.vector_store %arg5[%c0_13, %c0_14], %28 {strides = array<i32>} : memref<16x128xf32, #tpu.memory_space<vmem>>, vector<16x128xf32>,
    return
  }
  func.func @transform_0(%arg0: i32) -> (i32, i32) {
    %c0_i32 = arith.constant 0 : i32
    %c0_i32_0 = arith.constant 0 : i32
    return %arg0, %c0_i32 : i32, i32
  }
  func.func @transform_1(%arg0: i32) -> (i32, i32) {
    %c0_i32 = arith.constant 0 : i32
    %c0_i32_0 = arith.constant 0 : i32
    %c0_i32_1 = arith.constant 0 : i32
    return %c0_i32, %c0_i32_0 : i32, i32
  }
  func.func @transform_2(%arg0: i32) -> (i32, i32) {
    %c0_i32 = arith.constant 0 : i32
    %c0_i32_0 = arith.constant 0 : i32
    %c0_i32_1 = arith.constant 0 : i32
    return %c0_i32, %c0_i32_0 : i32, i32
  }
  func.func @transform_3(%arg0: i32) -> (i32, i32) {
    %c0_i32 = arith.constant 0 : i32
    %c0_i32_0 = arith.constant 0 : i32
    %c0_i32_1 = arith.constant 0 : i32
    return %c0_i32, %c0_i32_0 : i32, i32
  }
  func.func @transform_4(%arg0: i32) -> (i32, i32) {
    %c0_i32 = arith.constant 0 : i32
    %c0_i32_0 = arith.constant 0 : i32
    return %arg0, %c0_i32 : i32, i32
  }
}

</mosaic_0001>

<bundles_post_ra>
// kernel: tpu_custom_call.1
= control target key start
LH: loop header
LB: loop body
LE: loop exit
PB: predicated region body
PF: predicated region fallthrough
CT: control target
= control target key end

     0   :  { %9 = vsyncpa [#allocation3], 0  ;;  %s876_s0 = inlined_call_operand.hbm [shape: f32[32,128], index: 0, kind: input, shape index: {}]   ;;  %s877_s1 = inlined_call_operand.hbm [shape: f32[128,128], index: 1, kind: input, shape index: {}]   ;;  %s878_s2 = inlined_call_operand.vmem [shape: f32[1,128], index: 2, kind: input, shape index: {}]   ;;  %s879_s3 = inlined_call_operand.vmem [shape: f32[1,128], index: 3, kind: input, shape index: {}]   ;;  %s880_s4 = inlined_call_operand.hbm [shape: f32[32,128], index: 4, kind: output, shape index: {}]  }
   0x1   :  { %11 = vsyncpa [#allocation3 + $0x1], 0 }
   0x2   :  { %12 = vsyncpa [#allocation6], 0 }
   0x3   :  { %13 = vsyncpa [#allocation4], 0 }
   0x4   :  { %15 = vsyncpa [#allocation4 + $0x1], 0  ;;  %s722_s15 = smov 0   ;;  %s724_s16 = smov 0  }
   0x5   :  { %s726_s17 = smov 0   ;;  %s728_s18 = smov 0  }
   0x6 LB: > { %s743_s19 = sadd.s32 4294967295, %s690_s18   ;;  %s455_s20 = sadd.s32 4294967294, %s690_s18   ;;  %s690_s18 = sphi %s728_s18, %s890_s18   ;;  %s686_s17 = sphi %s726_s17, %s889_s17   ;;  %s682_s16 = sphi %s724_s16, %s888_s16   ;;  %s678_s15 = sphi %s722_s15, %s887_s15  }
   0x7   : > { %p41_p0 = scmp.ne.s32.totalorder %s682_s16, %s678_s15  ;;  %p42_p1 = scmp.eq.s32.totalorder %s743_s19, 0 }
   0x8   : > { %p128_p2 = scmp.eq.s32.totalorder %s743_s19, 1  ;;  %p134_p3 = scmp.eq.s32.totalorder %s455_s20, 1 }
   0x9   : > { %p752_p4 = por %p42_p1, %p41_p0  ;;  %p456_p5 = scmp.ge.s32.totalorder %s690_s18, 1 }
   0xa   : > { %p757_p6 = por %p134_p3, %p41_p0  ;;  %p141_p7 = scmp.lt.s32.totalorder %s690_s18, 3 }
   0xb   : > { %s152_s25 = sshll.u32 %s877_s1, 4  ;;  %s692_s27 = smov [#allocation5]   ;;  %s153_s25 = int_to_ptr.hbm [resolvable:$true] %s152_s25 }
   0xc   : > { %p765_p8 = pnand %p456_p5, %p141_p7  ;;  %s154_s28 = sshll.u32 %s692_s27, 4  ;;  %s155_s28 = int_to_ptr.vmem [resolvable:$true] %s154_s28 }
   0xd   : > { %s775_s29 = sadd.s32 1, %s690_s18   ;;  %s693_s30 = smov 128  }
   0xe   : > { %p497_p9 = pneg %p765_p8  ;;  %s694_s5 = smov 8  }
   0xf   : > { %s25_s6 = ssub.s32 %s690_s18, %s775_s29  ;;  %s28_s7 = sadd.s32 1, %s686_s17 }
  0x10   : > { %p498_p10 = pnand %p497_p9, %p42_p1  ;;  %p26_p12 = scmp.eq.s32.totalorder %s25_s6, 0 }
  0x11   : > { %p35_p13 = scmp.ne.s32.totalorder %s686_s17, %s682_s16  ;;  %p36_p0 = scmp.eq.s32.totalorder %s690_s18, 0 }
  0x12   : > { %500 = dma.hbm_to_vmem [thread:$0]  (!%p498_p10), %s153_s25, 2048, %s155_s28, [#allocation6], %s693_s30, %s693_s30, %s694_s5  }
  0x13   : > { %s787_s8 = scalar_select %p26_p12, %s686_s17, %s28_s7  }
  0x14   : > { %p791_p3 = por %p128_p2, %p35_p13  ;;  %p510_p5 = scmp.lt.s32.totalorder %s690_s18, 2 }
  0x15   : > { %s174_s10 = sand.u32 1, %s686_s17   ;;  %s471_s11 = sshll.u32 %s690_s18, 4 }
  0x16   : > { %p37_p7 = por %p36_p0, %p35_p13  ;;  %s459_s12 = sshll.u32 %s174_s10, 4 }
  0x17   : > { %s183_s20 = scalar_lea.hbm %s876_s0, %s471_s11  ;;  %s178_s24 = scalar_lea.vmem [#allocation2], %s459_s12 }
  0x18   : > { %s184_s23 = sshll.u32 %s183_s20, 4  ;;  %s186_s25 = sshll.u32 %s178_s24, 4  ;;  %s185_s23 = int_to_ptr.hbm [resolvable:$true] %s184_s23  ;;  %s187_s25 = int_to_ptr.vmem [resolvable:$true] %s186_s25 }
  0x19   : > { %p801_p9 = pnand %p510_p5, %p37_p7  ;;  %s175_s28 = scalar_lea.sflag [#allocation3], %s174_s10 }
  0x1a   : > { %s590_s6 = sshra.s32 %s185_s23, 4  ;;  %s597_s12 = scalar_lea.hbm %s876_s0, 32  ;;  %s591_s6 = int_to_ptr.hbm [resolvable:$true] %s590_s6 }
  0x1b   : > { %s592_s7 = scalar_lea.hbm %s591_s6, 16  ;;  %p594_p10 = pneg %p801_p9 }
  0x1c   : > { %p593_p2 = scmp.ne.s32.totalorder %s591_s6, %s592_s7  ;;  %p598_p0 = scmp.lt.s32.totalorder %s591_s6, %s876_s0 }
  0x1d   : > { %p599_p5 = scmp.lt.s32.totalorder %s597_s12, %s592_s7 }
  0x1e   : > { %p595_p12 = pnand %p594_p10, %p593_p2 }
  0x1f   : > { %p600_p7 = por %p599_p5, %p598_p0 }
  0x20   : > { %p596_p13 = pneg %p595_p12 }
  0x22   : > { %p601_p11 = pnand %p600_p7, %p596_p13 }
  0x24   : > { %604 = shalt.err (!%p601_p11)
}
  0x25   : > { %504 = dma.hbm_to_vmem [thread:$0]  (!%p801_p9), %s185_s23, 256, %s187_s25, %s175_s28, %s693_s30, %s693_s30, %s694_s5  }
  0x26   : > { %198 = sbr.rel (%p765_p8) target bundleno = 364 (0x16c), region = 36  ;;  %s821_s10 = sand.u32 (!%p765_p8), 1, %s682_s16  }
  0x27   : > { %s463_s24 = sshll.u32 (!%p765_p8), %s821_s10, 4  ;;  %s201_s6 = scalar_lea.sflag (!%p765_p8), [#allocation3], %s821_s10 }
  0x28   : > { %s204_s7 = scalar_lea.vmem (!%p765_p8), [#allocation2], %s463_s24 }
  0x2b   : > { %665 = dma.done.wait (%p752_p4), %s201_s6, 256  }
  0x2c   : > { %667 = vsyncadd (%p752_p4), %s201_s6, 4294967040 }
  0x2d   : > { %669 = dma.done.wait (%p42_p1), [#allocation6], 2048  }
  0x2e   : > { %671 = vsyncadd (%p42_p1), [#allocation6], 4294965248  ;;  %v284_v0 = vld [vmem:[#allocation5 + $0x78] sm:$0xff]  ;;  %v283_v1 = vld [vmem:[#allocation5 + $0x70] sm:$0xff]  ;;  %s472_s23 = sshll.u32 %s743_s19, 4  ;;  %s234_s11 = scalar_lea.vmem [#allocation7], %s463_s24 }
  0x2f   : > { %285 = vmatpush.msra.mxu0 %v284_v0  ;;  %473 = vmatpush.msra.mxu1 %v284_v0  ;;  %v237_v2 = vld [vmem:[%s204_s7] sm:$0xff]  ;;  %v282_v3 = vld [vmem:[#allocation5 + $0x68] sm:$0xff]  ;;  %v280_v7 = vld [vmem:[#allocation5 + $0x58] sm:$0xff]  ;;  %s368_s28 = scalar_lea.hbm %s880_s4, %s472_s23  ;;  %s369_s13 = sshll.u32 %s234_s11, 4  ;;  %s370_s13 = int_to_ptr.vmem [resolvable:$true] %s369_s13 }
  0x30   : > { %v239_v4 = vmul.f32 %v237_v2, %v237_v2  ;;  %v281_v5 = vld [vmem:[#allocation5 + $0x60] sm:$0xff]  ;;  %v238_v6 = vld [vmem:[%s204_s7 + $0x8] sm:$0xff]  ;;  %v279_v8 = vld [vmem:[#allocation5 + $0x50] sm:$0xff]  ;;  %s371_s12 = sshll.u32 %s368_s28, 4  ;;  %s357_s19 = scalar_lea.sflag [#allocation4], %s821_s10  ;;  %s372_s12 = int_to_ptr.hbm [resolvable:$true] %s371_s12 }
  0x31   : > { %286 = vmatpush.msra.mxu0 %v283_v1  ;;  %474 = vmatpush.msra.mxu1 %v283_v1  ;;  %v240_v9 = vmul.f32 %v238_v6, %v238_v6  ;;  %v278_v10 = vld [vmem:[#allocation5 + $0x48] sm:$0xff]  ;;  %v277_v11 = vld [vmem:[#allocation5 + $0x40] sm:$0xff]  ;;  %v276_v12 = vld [vmem:[#allocation5 + $0x38] sm:$0xff]  ;;  %s634_s14 = sshra.s32 %s372_s12, 4  ;;  %s640_s7 = scalar_lea.hbm %s880_s4, 32  ;;  %s635_s14 = int_to_ptr.hbm [resolvable:$true] %s634_s14 }
  0x32   : > { %241 = vadd.xlane.f32.xlu0 %v239_v4  ;;  %v275_v13 = vld [vmem:[#allocation5 + $0x30] sm:$0xff]  ;;  %v274_v14 = vld [vmem:[#allocation5 + $0x28] sm:$0xff]  ;;  %v273_v15 = vld [vmem:[#allocation5 + $0x20] sm:$0xff]  ;;  %s636_s20 = scalar_lea.hbm %s635_s14, 16  ;;  %p641_p11 = scmp.lt.s32.totalorder %s635_s14, %s880_s4 }
  0x33   : > { %287 = vmatpush.msra.mxu0 %v282_v3  ;;  %475 = vmatpush.msra.mxu1 %v282_v3  ;;  %v272_v16 = vld [vmem:[#allocation5 + $0x18] sm:$0xff]  ;;  %v271_v17 = vld [vmem:[#allocation5 + $0x10] sm:$0xff]  ;;  %v270_v18 = vld [vmem:[#allocation5 + $0x8] sm:$0xff]  ;;  %p637_p1 = scmp.ne.s32.totalorder %s635_s14, %s636_s20  ;;  %p642_p9 = scmp.lt.s32.totalorder %s640_s7, %s636_s20 }
  0x34   : > { %v269_v19 = vld [vmem:[#allocation5] sm:$0xff] }
  0x35   : > { %288 = vmatpush.msra.mxu0 %v281_v5  ;;  %476 = vmatpush.msra.mxu1 %v281_v5  ;;  %v550_v37 = vld [vmem:[%s878_s2] ss:$0 sm:$0xff]  ;;  %p638_p4 = pnand %p637_p1, %p791_p3  ;;  %p643_p2 = por %p642_p9, %p641_p11 }
  0x36   : > { %v551_v63 = vld [vmem:[%s879_s3] ss:$0 sm:$0xff] }
  0x37   : > { %289 = vmatpush.msra.mxu0 %v280_v7  ;;  %477 = vmatpush.msra.mxu1 %v280_v7  ;;  %p639_p8 = pneg %p638_p4 }
  0x39   : > { %290 = vmatpush.msra.mxu0 %v279_v8  ;;  %478 = vmatpush.msra.mxu1 %v279_v8  ;;  %p644_p10 = pnand %p643_p2, %p639_p8 }
  0x3a   : > { %243 = vadd.xlane.f32.xlu0 %v240_v9 }
  0x3b   : > { %291 = vmatpush.msra.mxu0 %v278_v10  ;;  %479 = vmatpush.msra.mxu1 %v278_v10 }
  0x3d   : > { %292 = vmatpush.msra.mxu0 %v277_v11  ;;  %480 = vmatpush.msra.mxu1 %v277_v11 }
  0x3f   : > { %293 = vmatpush.msra.mxu0 %v276_v12  ;;  %481 = vmatpush.msra.mxu1 %v276_v12 }
  0x41   : > { %294 = vmatpush.msra.mxu0 %v275_v13  ;;  %482 = vmatpush.msra.mxu1 %v275_v13 }
  0x43   : > { %295 = vmatpush.msra.mxu0 %v274_v14  ;;  %483 = vmatpush.msra.mxu1 %v274_v14 }
  0x45   : > { %296 = vmatpush.msra.mxu0 %v273_v15  ;;  %484 = vmatpush.msra.mxu1 %v273_v15 }
  0x47   : > { %297 = vmatpush.msra.mxu0 %v272_v16  ;;  %485 = vmatpush.msra.mxu1 %v272_v16 }
  0x49   : > { %298 = vmatpush.msra.mxu0 %v271_v17  ;;  %486 = vmatpush.msra.mxu1 %v271_v17 }
  0x4b   : > { %299 = vmatpush.msra.mxu0 %v270_v18  ;;  %487 = vmatpush.msra.mxu1 %v270_v18 }
  0x4d   : > { %300 = vmatpush.msra.mxu0 %v269_v19  ;;  %488 = vmatpush.msra.mxu1 %v269_v19 }
  0x4e   : > { %301 = vmatmul.f32.vlgmr.msra.gmra.mxu0 %v237_v2  ;;  %304 = vmatmul.f32.vlgmr.msra.gmra.mxu1 %v238_v6 }
  0xa5   : > { %v242_v20 = vpop.xlane.xlu0 %241 }
  0xa6   : > { %v245_v21 = vmul.f32 0.015625, %v242_v20 }
  0xa8   : > { %v247_v22 = vadd.f32 1e-05, %v245_v21 }
  0xaa   : > { %552 = vrsqrt.f32 %v247_v22  ;;  %vm255_vm0 = vweird.f32 %v247_v22 }
  0xad   : > { %v244_v23 = vpop.xlane.xlu0 %243 }
  0xae   : > { %v246_v24 = vmul.f32 0.015625, %v244_v23 }
  0xb0   : > { %v248_v25 = vadd.f32 1e-05, %v246_v24  ;;  %v553_v26 = vpop.eup %552 }
  0xb1   : > { %v250_v27 = vmul.f32 %v553_v26, %v247_v22  ;;  %vm256_vm1 = vweird.f32 %v553_v26 }
  0xb2   : > { %554 = vrsqrt.f32 %v248_v25  ;;  %vm257_vm2 = vmor %vm255_vm0, %vm256_vm1  ;;  %vm265_vm3 = vweird.f32 %v248_v25 }
  0xb3   : > { %v251_v29 = vmul.f32 %v553_v26, %v250_v27 }
  0xb5   : > { %v252_v31 = vmul.f32 0.5, %v251_v29 }
  0xb7   : > { %v253_v34 = vsub.f32 1.5, %v252_v31 }
  0xb8   : > { %v555_v28 = vpop.eup %554 }
  0xb9   : > { %v260_v30 = vmul.f32 %v555_v28, %v248_v25  ;;  %v254_v36 = vmul.f32 %v553_v26, %v253_v34  ;;  %vm266_vm4 = vweird.f32 %v555_v28 }
  0xba   : > { %vm267_vm5 = vmor %vm265_vm3, %vm266_vm4 }
  0xbb   : > { %v261_v32 = vmul.f32 %v555_v28, %v260_v30  ;;  %v258_v38 = vsel %vm257_vm2, %v553_v26, %v254_v36 }
  0xbd   : > { %v262_v33 = vmul.f32 0.5, %v261_v32 }
  0xbf   : > { %v263_v35 = vsub.f32 1.5, %v262_v33 }
  0xc1   : > { %v264_v40 = vmul.f32 %v555_v28, %v263_v35 }
  0xc3   : > { %v268_v44 = vsel %vm267_vm5, %v555_v28, %v264_v40 }
  0xcb   : > { %v302_v39 = vpop.f32.mrf.mxu0  ;;  %v305_v42 = vpop.f32.mrf.mxu1 }
  0xcc   : > { %v308_v41 = vmul.f32 %v302_v39, %v258_v38  ;;  %v309_v45 = vmul.f32 %v305_v42, %v268_v44 }
  0xce   : > { %v314_v43 = vadd.f32 %v550_v37, %v308_v41  ;;  %v315_v47 = vadd.f32 %v550_v37, %v309_v45 }
  0xd0   : > { %v316_v46 = vmul.f32 %v314_v43, %v314_v43  ;;  %v317_v48 = vmul.f32 %v315_v47, %v315_v47 }
  0xd2   : > { %318 = vadd.xlane.f32.xlu1 %v316_v46 }
  0xda   : > { %320 = vadd.xlane.f32.xlu1 %v317_v48 }
 0x145   : > { %v319_v49 = vpop.xlane.xlu1 %318 }
 0x146   : > { %v322_v50 = vmul.f32 0.03125, %v319_v49 }
 0x148   : > { %v324_v51 = vadd.f32 1e-05, %v322_v50 }
 0x14a   : > { %556 = vrsqrt.f32 %v324_v51  ;;  %vm332_vm7 = vweird.f32 %v324_v51 }
 0x14d   : > { %v321_v52 = vpop.xlane.xlu1 %320 }
 0x14e   : > { %v323_v53 = vmul.f32 0.03125, %v321_v52 }
 0x150   : > { %v557_v54 = vpop.eup %556  ;;  %v325_v55 = vadd.f32 1e-05, %v323_v53 }
 0x151   : > { %v327_v56 = vmul.f32 %v557_v54, %v324_v51  ;;  %vm333_vm6 = vweird.f32 %v557_v54 }
 0x152   : > { %558 = vrsqrt.f32 %v325_v55  ;;  %vm334_vm8 = vmor %vm332_vm7, %vm333_vm6  ;;  %vm342_vm10 = vweird.f32 %v325_v55 }
 0x153   : > { %v328_v57 = vmul.f32 %v557_v54, %v327_v56 }
 0x155   : > { %v329_v58 = vmul.f32 0.5, %v328_v57 }
 0x157   : > { %v330_v59 = vsub.f32 1.5, %v329_v58 }
 0x158   : > { %v559_v60 = vpop.eup %558 }
 0x159   : > { %v331_v61 = vmul.f32 %v557_v54, %v330_v59  ;;  %v337_v62 = vmul.f32 %v559_v60, %v325_v55  ;;  %vm343_vm9 = vweird.f32 %v559_v60 }
 0x15a   : > { %vm344_vm11 = vmor %vm342_vm10, %vm343_vm9 }
 0x15b   : > { %v335_v0 = vsel %vm334_vm8, %v557_v54, %v331_v61  ;;  %v338_v1 = vmul.f32 %v559_v60, %v337_v62 }
 0x15c   : > { %v346_v2 = vmul.f32 %v335_v0, %v314_v43 }
 0x15d   : > { %v339_v3 = vmul.f32 0.5, %v338_v1 }
 0x15e   : > { %v352_v4 = vmul.f32 %v551_v63, %v346_v2 }
 0x15f   : > { %v340_v5 = vsub.f32 1.5, %v339_v3 }
 0x160   : > { %354 = vst [vmem:[%s234_s11] sm:$0xff] %v352_v4 }
 0x161   : > { %v341_v6 = vmul.f32 %v559_v60, %v340_v5 }
 0x163   : > { %v345_v7 = vsel %vm344_vm11, %v559_v60, %v341_v6 }
 0x164   : > { %v347_v8 = vmul.f32 %v345_v7, %v315_v47 }
 0x166   : > { %v353_v9 = vmul.f32 %v551_v63, %v347_v8 }
 0x168   : > { %355 = vst [vmem:[%s234_s11 + $0x8] sm:$0xff] %v353_v9 }
 0x169   : > { %647 = shalt.err (!%p644_p10)
}
 0x16a   : > { %s695_s10 = smov 128   ;;  %s696_s30 = smov 8  }
 0x16b   : > { %495 = dma.vmem_to_hbm [thread:$0]  (%p791_p3), %s370_s13, 256, %s372_s12, %s357_s19, %s695_s10, %s695_s10, %s696_s30  }
 0x16c PF: > { %s386_s5 = sand.u32 1, %s678_s15   ;;  %p886_p12 = scmp.ge.s32.totalorder %s690_s18, 2 }
 0x16d   : > { %s387_s23 = scalar_lea.sflag [#allocation4], %s386_s5 }
 0x16e   : > { %p506_p13 = pnand %p886_p12, %p757_p6 }
 0x170   : > { %p507_p0 = pneg %p506_p13 }
 0x172   : > { %673 = dma.done.wait (%p507_p0), %s387_s23, 256  }
 0x173   : > { %675 = vsyncadd (%p507_p0), %s387_s23, 4294967040  ;;  %p18_p5 = scmp.ge.s32.totalorder %s775_s29, 4   ;;  %s887_s15 = smov %s682_s16 }
 0x174   : > { %s888_s16 = smov %s686_s17  ;;  %s889_s17 = smov %s787_s8 }
 0x175   : > { %s890_s18 = smov %s775_s29  ;;  %20 = sbr.rel (!%p18_p5) target bundleno = 6 (0x6), region = 85 }
 0x17a   :  { %393 = vsyncpa [#allocation3], 1 }
 0x17b   :  { %395 = vsyncpa [#allocation3 + $0x1], 1 }
 0x17c   :  { %396 = vsyncpa [#allocation6], 1 }
 0x17d   :  { %397 = vsyncpa [#allocation4], 1 }
 0x17e   :  { %399 = vsyncpa [#allocation4 + $0x1], 1 }

</bundles_post_ra>
